<compile_context>
chip_gen: v6e
topology: v6e:2x2x1
jax: 0.10.0
libtpu: 0.0.40
codegen_flags: <defaults>
</compile_context>

<pallas_src>
from functools import partial

import jax
import jax.numpy as jnp
from jax.experimental import pallas as pl
from jax.experimental.pallas import tpu as pltpu


def _decoder_kernel(H, PH,
                    hid0_ref, xg_ref,
                    gr_ref, whh_ref, gbhh_ref,
                    gm_ref, wm_ref, gbm_ref,
                    out_ref):
    """Per-batch-element ph-step GRU recurrence + fc_mean head.

    hid0_ref : [N, H]    initial hidden (prologue computed in XLA)
    xg_ref   : [N, 3H]   loop-invariant GRU input-gate pre-activations
    gr_ref   : [N, N]    GRU graph influence (row-normalized), possibly bf16
    whh_ref  : [H, 3H]   GRU hidden->gates weight, possibly bf16
    gbhh_ref : [N, 3H]   Gr @ bhh (f32)
    gm_ref   : [N, N]    fc_mean graph influence, possibly bf16
    wm_ref   : [H, O]    fc_mean weight, possibly bf16
    gbm_ref  : [N, O]    Gm @ bm (f32)
    out_ref  : [N, PH*O] all horizon steps concatenated along lanes
    """
    f32 = jnp.float32

    gr = gr_ref[...]
    whh = whh_ref[...]
    gbhh = gbhh_ref[...]
    gm = gm_ref[...]
    wm = wm_ref[...]
    gbm = gbm_ref[...]

    xg = xg_ref[...]
    xg_r = xg[:, 0 * H:1 * H]
    xg_z = xg[:, 1 * H:2 * H]
    xg_n = xg[:, 2 * H:3 * H]

    hid = hid0_ref[...]                       # f32 hidden state, lives in vregs

    ys = []
    # TODO(synk): for large PH replace this static unroll with
    # lax.fori_loop(..., unroll=True) + a VMEM scratch hidden state to bound
    # vreg live ranges; at PH=2 the unroll is cheaper.
    for _ in range(PH):
        # graph mix + hidden->gates (bf16 MXU inputs, f32 accumulation)
        hmix = jnp.dot(gr, hid.astype(gr.dtype), preferred_element_type=f32)      # [N, H]
        hg = jnp.dot(hmix.astype(whh.dtype), whh, preferred_element_type=f32) + gbhh  # [N, 3H]

        r = jax.nn.sigmoid(xg_r + hg[:, 0 * H:1 * H])
        z = jax.nn.sigmoid(xg_z + hg[:, 1 * H:2 * H])
        n = jnp.tanh(xg_n + r * hg[:, 2 * H:3 * H])
        hid = (1.0 - z) * n + z * hid                                             # [N, H]

        # activation_fn (hip_mode='velocity' -> tanh); dropout(p=0) == identity
        y = jnp.tanh(hid)

        # fc_mean (StaticGraphLinear) followed by activation_fn again
        ym = (jnp.dot(jnp.dot(gm, y.astype(gm.dtype),
                              preferred_element_type=f32).astype(wm.dtype),
                      wm, preferred_element_type=f32)
              + gbm)                                                               # [N, O]
        ys.append(jnp.tanh(ym))

    # single lane-dense store of all PH horizon steps
    out_ref[...] = jnp.concatenate(ys, axis=-1)


def _l1_row_normalize(g):
    return g / jnp.maximum(jnp.sum(jnp.abs(g), axis=-1, keepdims=True), 1e-12)


def decoder_forward(x, h, params, ph=2, use_bf16=True):
    """x: [B, T, N, F], h: [B, N, I]. Returns (p_mean [B, ph, N, O], x_t_s [B, N, F])."""
    B, _, N, F = x.shape
    I = h.shape[-1]
    H = params["w0h"].shape[1]
    O = params["wm"].shape[1]

    x_t = x[:, -1]
    x_t_1 = x[:, -2]          # state is None -> x[:, -2]

    # learn_influence=True -> L1 row-normalization of the influence matrices (glue)
    g0 = _l1_row_normalize(params["g0"])
    gr = _l1_row_normalize(params["gr"] + params["ga"])   # additive learned graph influence
    gm = _l1_row_normalize(params["gm"])

    # concatenated activations and concatenated (x|h) weights
    xh_t1 = jnp.concatenate([x_t_1, h], axis=-1)          # [B, N, F+I]
    xh_t = jnp.concatenate([x_t, h], axis=-1)             # [B, N, F+I]
    w0 = jnp.concatenate([params["w0x"], params["w0h"]], axis=0)     # [F+I, H]
    wi = jnp.concatenate([params["wix"], params["wih"]], axis=0)     # [F+I, 3H]

    # --- one-time prologue hoisted out of the kernel (runs as plain XLA, f32) ---
    # hid0 = G0 @ (cat(x_{t-1}, h) @ W0 + b0), xg = Gr @ (cat(x_t, h) @ Wi + bih)
    hid0 = jnp.einsum("nm,bmh->bnh", g0,
                      jnp.einsum("bnf,fh->bnh", xh_t1, w0) + params["b0"])         # [B, N, H]
    xg = jnp.einsum("nm,bmg->bng", gr,
                    jnp.einsum("bnf,fg->bng", xh_t, wi) + params["bih"])           # [B, N, 3H]

    # graph-folded biases (exact: G@(XW + b) = (G@X)W + G@b), kept per-node [N, ...]
    gbhh = gr @ params["bhh"]      # [N, 3H]
    gbm = gm @ params["bm"]        # [N, O]

    # bf16 matmul operands with f32 accumulation (MXU-native on v5e/v6e/v7x)
    wdt = jnp.bfloat16 if use_bf16 else jnp.float32
    gr_k = gr.astype(wdt)
    gm_k = gm.astype(wdt)
    whh_k = params["whh"].astype(wdt)
    wm_k = params["wm"].astype(wdt)

    in_specs = [
        pl.BlockSpec((None, N, H), lambda b: (b, 0, 0)),        # hid0 (per batch)
        pl.BlockSpec((None, N, 3 * H), lambda b: (b, 0, 0)),    # xg   (per batch)
        pl.BlockSpec((N, N), lambda b: (0, 0)),                 # gr   (VMEM-resident)
        pl.BlockSpec((H, 3 * H), lambda b: (0, 0)),             # whh
        pl.BlockSpec((N, 3 * H), lambda b: (0, 0)),             # gbhh
        pl.BlockSpec((N, N), lambda b: (0, 0)),                 # gm
        pl.BlockSpec((H, O), lambda b: (0, 0)),                 # wm
        pl.BlockSpec((N, O), lambda b: (0, 0)),                 # gbm
    ]
    out_spec = pl.BlockSpec((None, N, ph * O), lambda b: (b, 0, 0))

    out_flat = pl.pallas_call(
        partial(_decoder_kernel, H, ph),
        out_shape=jax.ShapeDtypeStruct((B, N, ph * O), jnp.float32),
        grid_spec=pltpu.PrefetchScalarGridSpec(
            num_scalar_prefetch=0,
            grid=(B,),
            in_specs=in_specs,
            out_specs=out_spec,
        ),
        compiler_params=pltpu.CompilerParams(
            dimension_semantics=("parallel",)),   # batch shards across TCs on v7x
    )(hid0, xg, gr_k, whh_k, gbhh, gm_k, wm_k, gbm)

    p_mean = out_flat.reshape(B, N, ph, O).transpose(0, 2, 1, 3)   # [B, ph, N, O]
    x_t_s = x_t  # x_t.clone()
    return p_mean, x_t_s


def decoder_reference(x, h, params, ph=2):
    """Pure-JAX reference mirroring the PyTorch forward (for validation)."""
    H = params["w0h"].shape[1]
    x_t = x[:, -1]
    x_t_1 = x[:, -2]
    g0 = _l1_row_normalize(params["g0"])
    gr = _l1_row_normalize(params["gr"] + params["ga"])
    gm = _l1_row_normalize(params["gm"])

    def gmix(G, v):
        return jnp.einsum("nm,bmo->bno", G, v)

    rnn_h = gmix(g0, jnp.einsum("bnf,fh->bnh", x_t_1, params["w0x"])
                 + jnp.einsum("bni,ih->bnh", h, params["w0h"]) + params["b0"])
    hid = rnn_h
    outs = []
    for _ in range(ph):
        xg = gmix(gr, jnp.einsum("bnf,fg->bng", x_t, params["wix"])
                  + jnp.einsum("bni,ig->bng", h, params["wih"]) + params["bih"])
        hg = gmix(gr, jnp.einsum("bnh,hg->bng", hid, params["whh"]) + params["bhh"])
        r = jax.nn.sigmoid(xg[..., :H] + hg[..., :H])
        zg = jax.nn.sigmoid(xg[..., H:2 * H] + hg[..., H:2 * H])
        n = jnp.tanh(xg[..., 2 * H:] + r * hg[..., 2 * H:])
        hid = (1.0 - zg) * n + zg * hid
        y = jnp.tanh(hid)
        ym = gmix(gm, jnp.einsum("bnh,ho->bno", y, params["wm"]) + params["bm"])
        outs.append(jnp.tanh(ym))
    return jnp.stack(outs, axis=1), x_t


def init_params(key, N, F, I, H, O):
    ks = jax.random.split(key, 16)
    nrm = lambda k, shape, s=0.2: (s * jax.random.normal(k, shape)).astype(jnp.float32)
    eye = jnp.eye(N, dtype=jnp.float32)
    return {
        "g0": eye + nrm(ks[0], (N, N), 0.05),
        "w0x": nrm(ks[1], (F, H)),
        "w0h": nrm(ks[2], (I, H)),
        "b0": nrm(ks[3], (N, H), 0.1),
        "gr": eye + nrm(ks[4], (N, N), 0.05),
        "ga": nrm(ks[5], (N, N), 0.02),
        "wix": nrm(ks[6], (F, 3 * H)),
        "wih": nrm(ks[7], (I, 3 * H)),
        "whh": nrm(ks[8], (H, 3 * H)),
        "bih": nrm(ks[9], (N, 3 * H), 0.1),
        "bhh": nrm(ks[10], (N, 3 * H), 0.1),
        "gm": eye + nrm(ks[11], (N, N), 0.05),
        "wm": nrm(ks[12], (H, O)),
        "bm": nrm(ks[13], (N, O), 0.1),
    }


if __name__ == "__main__":
    # small shapes: batch=2, history T=3, num_nodes=4, feature_size=6,
    # input_size (latent h)=5, hidden_size=16, output_size=6, ph=2
    # (for realistic deployments pick H/O as multiples of 128 for lane-dense tiles)
    B, T, N, F, I, H, O, PH = 2, 3, 4, 6, 5, 16, 6, 2

    key = jax.random.PRNGKey(0)
    kx, kh, kp = jax.random.split(key, 3)
    x = jax.random.normal(kx, (B, T, N, F), dtype=jnp.float32)
    h = jax.random.normal(kh, (B, N, I), dtype=jnp.float32)
    params = init_params(kp, N, F, I, H, O)

    p_ref, x_ref = decoder_reference(x, h, params, ph=PH)

    # exact-precision path (f32 in-kernel weights)
    p32, xs32 = decoder_forward(x, h, params, ph=PH, use_bf16=False)
    p32 = jax.block_until_ready(p32)
    xs32 = jax.block_until_ready(xs32)
    assert p32.shape == (B, PH, N, O)
    assert xs32.shape == (B, N, F)
    assert jnp.allclose(p32, p_ref, rtol=1e-3, atol=1e-3)
    assert jnp.allclose(xs32, x_ref)

    # bf16 MXU path (f32 accumulation, f32 hidden state) — looser tolerance
    pbf, _ = decoder_forward(x, h, params, ph=PH, use_bf16=True)
    pbf = jax.block_until_ready(pbf)
    assert pbf.shape == (B, PH, N, O)
    assert jnp.allclose(pbf, p_ref, rtol=3e-2, atol=3e-2)

    print("KERNEL_OK")
</pallas_src>

<mosaic_0001>
module attributes {stable_mosaic.version = 11 : i64} {
  func.func @_decoder_kernel(%arg0: i32, %arg1: memref<1x4x16xf32, #tpu.memory_space<vmem>>, %arg2: memref<1x4x48xf32, #tpu.memory_space<vmem>>, %arg3: memref<4x4xf32, #tpu.memory_space<vmem>>, %arg4: memref<16x48xf32, #tpu.memory_space<vmem>>, %arg5: memref<4x48xf32, #tpu.memory_space<vmem>>, %arg6: memref<4x4xf32, #tpu.memory_space<vmem>>, %arg7: memref<16x6xf32, #tpu.memory_space<vmem>>, %arg8: memref<4x6xf32, #tpu.memory_space<vmem>>, %arg9: memref<1x4x12xf32, #tpu.memory_space<vmem>>) attributes {dimension_semantics = [#tpu.dimension_semantics<parallel>], iteration_bounds = array<i64: 2>, scalar_prefetch = 0 : i64, scratch_operands = 0 : i64, tpu.core_type = #tpu.core_type<tc>, window_params = [{transform_indices = @transform_0, window_bounds = array<i64: 1, 4, 16>}, {transform_indices = @transform_1, window_bounds = array<i64: 1, 4, 48>}, {pipeline_mode = #tpu.pipeline_mode<synchronous>, transform_indices = @transform_2, window_bounds = array<i64: 4, 4>}, {pipeline_mode = #tpu.pipeline_mode<synchronous>, transform_indices = @transform_3, window_bounds = array<i64: 16, 48>}, {pipeline_mode = #tpu.pipeline_mode<synchronous>, transform_indices = @transform_4, window_bounds = array<i64: 4, 48>}, {pipeline_mode = #tpu.pipeline_mode<synchronous>, transform_indices = @transform_5, window_bounds = array<i64: 4, 4>}, {pipeline_mode = #tpu.pipeline_mode<synchronous>, transform_indices = @transform_6, window_bounds = array<i64: 16, 6>}, {pipeline_mode = #tpu.pipeline_mode<synchronous>, transform_indices = @transform_7, window_bounds = array<i64: 4, 6>}, {transform_indices = @transform_8, window_bounds = array<i64: 1, 4, 12>}]} {
    %c0 = arith.constant 0 : index
    %c0_0 = arith.constant 0 : index
    %0 = vector.load %arg3[%c0, %c0_0] : memref<4x4xf32, #tpu.memory_space<vmem>>, vector<4x4xf32>
    %c0_1 = arith.constant 0 : index
    %c0_2 = arith.constant 0 : index
    %1 = vector.load %arg4[%c0_1, %c0_2] : memref<16x48xf32, #tpu.memory_space<vmem>>, vector<16x48xf32>
    %c0_3 = arith.constant 0 : index
    %c0_4 = arith.constant 0 : index
    %2 = vector.load %arg5[%c0_3, %c0_4] : memref<4x48xf32, #tpu.memory_space<vmem>>, vector<4x48xf32>
    %c0_5 = arith.constant 0 : index
    %c0_6 = arith.constant 0 : index
    %3 = vector.load %arg6[%c0_5, %c0_6] : memref<4x4xf32, #tpu.memory_space<vmem>>, vector<4x4xf32>
    %c0_7 = arith.constant 0 : index
    %c0_8 = arith.constant 0 : index
    %4 = vector.load %arg7[%c0_7, %c0_8] : memref<16x6xf32, #tpu.memory_space<vmem>>, vector<16x6xf32>
    %c0_9 = arith.constant 0 : index
    %c0_10 = arith.constant 0 : index
    %5 = vector.load %arg8[%c0_9, %c0_10] : memref<4x6xf32, #tpu.memory_space<vmem>>, vector<4x6xf32>
    %c0_11 = arith.constant 0 : index
    %c0_12 = arith.constant 0 : index
    %c0_13 = arith.constant 0 : index
    %6 = vector.load %arg2[%c0_11, %c0_12, %c0_13] : memref<1x4x48xf32, #tpu.memory_space<vmem>>, vector<1x4x48xf32>
    %7 = vector.shape_cast %6 : vector<1x4x48xf32> to vector<4x48xf32>
    %8 = vector.extract_strided_slice %7 {offsets = [0, 0], sizes = [4, 16], strides = [1, 1]} : vector<4x48xf32> to vector<4x16xf32>
    %9 = vector.extract_strided_slice %7 {offsets = [0, 16], sizes = [4, 16], strides = [1, 1]} : vector<4x48xf32> to vector<4x16xf32>
    %10 = vector.extract_strided_slice %7 {offsets = [0, 32], sizes = [4, 16], strides = [1, 1]} : vector<4x48xf32> to vector<4x16xf32>
    %c0_14 = arith.constant 0 : index
    %c0_15 = arith.constant 0 : index
    %c0_16 = arith.constant 0 : index
    %11 = vector.load %arg1[%c0_14, %c0_15, %c0_16] : memref<1x4x16xf32, #tpu.memory_space<vmem>>, vector<1x4x16xf32>
    %12 = vector.shape_cast %11 : vector<1x4x16xf32> to vector<4x16xf32>
    %cst = arith.constant dense<0.000000e+00> : vector<4x16xf32>
    %13 = tpu.matmul %0, %12, %cst {dimension_numbers = #tpu.dot_dimension_numbers<[1], [0], [0], [1], [0, 0, 1, 1], [], []>} : vector<4x4xf32>, vector<4x16xf32>, vector<4x16xf32> -> vector<4x16xf32>
    %cst_17 = arith.constant dense<0.000000e+00> : vector<4x48xf32>
    %14 = tpu.matmul %13, %1, %cst_17 {dimension_numbers = #tpu.dot_dimension_numbers<[1], [0], [0], [1], [0, 0, 1, 1], [], []>} : vector<4x16xf32>, vector<16x48xf32>, vector<4x48xf32> -> vector<4x48xf32>
    %15 = arith.addf %14, %2 : vector<4x48xf32>
    %16 = vector.extract_strided_slice %15 {offsets = [0, 0], sizes = [4, 16], strides = [1, 1]} : vector<4x48xf32> to vector<4x16xf32>
    %17 = arith.addf %8, %16 : vector<4x16xf32>
    %18 = arith.negf %17 : vector<4x16xf32>
    %19 = math.exp %18 : vector<4x16xf32>
    %cst_18 = arith.constant 1.000000e+00 : f32
    %20 = vector.broadcast %cst_18 : f32 to vector<4x16xf32>
    %21 = arith.addf %20, %19 : vector<4x16xf32>
    %22 = arith.divf %20, %21 : vector<4x16xf32>
    %23 = vector.extract_strided_slice %15 {offsets = [0, 16], sizes = [4, 16], strides = [1, 1]} : vector<4x48xf32> to vector<4x16xf32>
    %24 = arith.addf %9, %23 : vector<4x16xf32>
    %25 = arith.negf %24 : vector<4x16xf32>
    %26 = math.exp %25 : vector<4x16xf32>
    %cst_19 = arith.constant 1.000000e+00 : f32
    %27 = vector.broadcast %cst_19 : f32 to vector<4x16xf32>
    %28 = arith.addf %27, %26 : vector<4x16xf32>
    %29 = arith.divf %27, %28 : vector<4x16xf32>
    %30 = vector.extract_strided_slice %15 {offsets = [0, 32], sizes = [4, 16], strides = [1, 1]} : vector<4x48xf32> to vector<4x16xf32>
    %31 = arith.mulf %22, %30 : vector<4x16xf32>
    %32 = arith.addf %10, %31 : vector<4x16xf32>
    %33 = math.tanh %32 : vector<4x16xf32>
    %cst_20 = arith.constant 1.000000e+00 : f32
    %34 = vector.broadcast %cst_20 : f32 to vector<4x16xf32>
    %35 = arith.subf %34, %29 : vector<4x16xf32>
    %36 = arith.mulf %35, %33 : vector<4x16xf32>
    %37 = arith.mulf %29, %12 : vector<4x16xf32>
    %38 = arith.addf %36, %37 : vector<4x16xf32>
    %39 = math.tanh %38 : vector<4x16xf32>
    %cst_21 = arith.constant dense<0.000000e+00> : vector<4x16xf32>
    %40 = tpu.matmul %3, %39, %cst_21 {dimension_numbers = #tpu.dot_dimension_numbers<[1], [0], [0], [1], [0, 0, 1, 1], [], []>} : vector<4x4xf32>, vector<4x16xf32>, vector<4x16xf32> -> vector<4x16xf32>
    %cst_22 = arith.constant dense<0.000000e+00> : vector<4x6xf32>
    %41 = tpu.matmul %40, %4, %cst_22 {dimension_numbers = #tpu.dot_dimension_numbers<[1], [0], [0], [1], [0, 0, 1, 1], [], []>} : vector<4x16xf32>, vector<16x6xf32>, vector<4x6xf32> -> vector<4x6xf32>
    %42 = arith.addf %41, %5 : vector<4x6xf32>
    %43 = math.tanh %42 : vector<4x6xf32>
    %cst_23 = arith.constant dense<0.000000e+00> : vector<4x16xf32>
    %44 = tpu.matmul %0, %38, %cst_23 {dimension_numbers = #tpu.dot_dimension_numbers<[1], [0], [0], [1], [0, 0, 1, 1], [], []>} : vector<4x4xf32>, vector<4x16xf32>, vector<4x16xf32> -> vector<4x16xf32>
    %cst_24 = arith.constant dense<0.000000e+00> : vector<4x48xf32>
    %45 = tpu.matmul %44, %1, %cst_24 {dimension_numbers = #tpu.dot_dimension_numbers<[1], [0], [0], [1], [0, 0, 1, 1], [], []>} : vector<4x16xf32>, vector<16x48xf32>, vector<4x48xf32> -> vector<4x48xf32>
    %46 = arith.addf %45, %2 : vector<4x48xf32>
    %47 = vector.extract_strided_slice %46 {offsets = [0, 0], sizes = [4, 16], strides = [1, 1]} : vector<4x48xf32> to vector<4x16xf32>
    %48 = arith.addf %8, %47 : vector<4x16xf32>
    %49 = arith.negf %48 : vector<4x16xf32>
    %50 = math.exp %49 : vector<4x16xf32>
    %cst_25 = arith.constant 1.000000e+00 : f32
    %51 = vector.broadcast %cst_25 : f32 to vector<4x16xf32>
    %52 = arith.addf %51, %50 : vector<4x16xf32>
    %53 = arith.divf %51, %52 : vector<4x16xf32>
    %54 = vector.extract_strided_slice %46 {offsets = [0, 16], sizes = [4, 16], strides = [1, 1]} : vector<4x48xf32> to vector<4x16xf32>
    %55 = arith.addf %9, %54 : vector<4x16xf32>
    %56 = arith.negf %55 : vector<4x16xf32>
    %57 = math.exp %56 : vector<4x16xf32>
    %cst_26 = arith.constant 1.000000e+00 : f32
    %58 = vector.broadcast %cst_26 : f32 to vector<4x16xf32>
    %59 = arith.addf %58, %57 : vector<4x16xf32>
    %60 = arith.divf %58, %59 : vector<4x16xf32>
    %61 = vector.extract_strided_slice %46 {offsets = [0, 32], sizes = [4, 16], strides = [1, 1]} : vector<4x48xf32> to vector<4x16xf32>
    %62 = arith.mulf %53, %61 : vector<4x16xf32>
    %63 = arith.addf %10, %62 : vector<4x16xf32>
    %64 = math.tanh %63 : vector<4x16xf32>
    %cst_27 = arith.constant 1.000000e+00 : f32
    %65 = vector.broadcast %cst_27 : f32 to vector<4x16xf32>
    %66 = arith.subf %65, %60 : vector<4x16xf32>
    %67 = arith.mulf %66, %64 : vector<4x16xf32>
    %68 = arith.mulf %60, %38 : vector<4x16xf32>
    %69 = arith.addf %67, %68 : vector<4x16xf32>
    %70 = math.tanh %69 : vector<4x16xf32>
    %cst_28 = arith.constant dense<0.000000e+00> : vector<4x16xf32>
    %71 = tpu.matmul %3, %70, %cst_28 {dimension_numbers = #tpu.dot_dimension_numbers<[1], [0], [0], [1], [0, 0, 1, 1], [], []>} : vector<4x4xf32>, vector<4x16xf32>, vector<4x16xf32> -> vector<4x16xf32>
    %cst_29 = arith.constant dense<0.000000e+00> : vector<4x6xf32>
    %72 = tpu.matmul %71, %4, %cst_29 {dimension_numbers = #tpu.dot_dimension_numbers<[1], [0], [0], [1], [0, 0, 1, 1], [], []>} : vector<4x16xf32>, vector<16x6xf32>, vector<4x6xf32> -> vector<4x6xf32>
    %73 = arith.addf %72, %5 : vector<4x6xf32>
    %74 = math.tanh %73 : vector<4x6xf32>
    %75 = tpu.concatenate %43, %74 in 1 : vector<4x6xf32>, vector<4x6xf32> -> vector<4x12xf32>
    %c0_30 = arith.constant 0 : index
    %c0_31 = arith.constant 0 : index
    %c0_32 = arith.constant 0 : index
    %76 = vector.load %arg9[%c0_30, %c0_31, %c0_32] : memref<1x4x12xf32, #tpu.memory_space<vmem>>, vector<1x4x12xf32>
    %77 = vector.shape_cast %76 : vector<1x4x12xf32> to vector<4x12xf32>
    %78 = vector.shape_cast %75 : vector<4x12xf32> to vector<1x4x12xf32>
    tpu.vector_store %arg9[%c0_30, %c0_31, %c0_32], %78 {strides = array<i32>} : memref<1x4x12xf32, #tpu.memory_space<vmem>>, vector<1x4x12xf32>,
    return
  }
  func.func @transform_0(%arg0: i32) -> (i32, i32, i32) {
    %c0_i32 = arith.constant 0 : i32
    %c0_i32_0 = arith.constant 0 : i32
    %c0_i32_1 = arith.constant 0 : i32
    return %arg0, %c0_i32, %c0_i32_0 : i32, i32, i32
  }
  func.func @transform_1(%arg0: i32) -> (i32, i32, i32) {
    %c0_i32 = arith.constant 0 : i32
    %c0_i32_0 = arith.constant 0 : i32
    %c0_i32_1 = arith.constant 0 : i32
    return %arg0, %c0_i32, %c0_i32_0 : i32, i32, i32
  }
  func.func @transform_2(%arg0: i32) -> (i32, i32) {
    %c0_i32 = arith.constant 0 : i32
    %c0_i32_0 = arith.constant 0 : i32
    %c0_i32_1 = arith.constant 0 : i32
    return %c0_i32, %c0_i32_0 : i32, i32
  }
  func.func @transform_3(%arg0: i32) -> (i32, i32) {
    %c0_i32 = arith.constant 0 : i32
    %c0_i32_0 = arith.constant 0 : i32
    %c0_i32_1 = arith.constant 0 : i32
    return %c0_i32, %c0_i32_0 : i32, i32
  }
  func.func @transform_4(%arg0: i32) -> (i32, i32) {
    %c0_i32 = arith.constant 0 : i32
    %c0_i32_0 = arith.constant 0 : i32
    %c0_i32_1 = arith.constant 0 : i32
    return %c0_i32, %c0_i32_0 : i32, i32
  }
  func.func @transform_5(%arg0: i32) -> (i32, i32) {
    %c0_i32 = arith.constant 0 : i32
    %c0_i32_0 = arith.constant 0 : i32
    %c0_i32_1 = arith.constant 0 : i32
    return %c0_i32, %c0_i32_0 : i32, i32
  }
  func.func @transform_6(%arg0: i32) -> (i32, i32) {
    %c0_i32 = arith.constant 0 : i32
    %c0_i32_0 = arith.constant 0 : i32
    %c0_i32_1 = arith.constant 0 : i32
    return %c0_i32, %c0_i32_0 : i32, i32
  }
  func.func @transform_7(%arg0: i32) -> (i32, i32) {
    %c0_i32 = arith.constant 0 : i32
    %c0_i32_0 = arith.constant 0 : i32
    %c0_i32_1 = arith.constant 0 : i32
    return %c0_i32, %c0_i32_0 : i32, i32
  }
  func.func @transform_8(%arg0: i32) -> (i32, i32, i32) {
    %c0_i32 = arith.constant 0 : i32
    %c0_i32_0 = arith.constant 0 : i32
    %c0_i32_1 = arith.constant 0 : i32
    return %arg0, %c0_i32, %c0_i32_0 : i32, i32, i32
  }
}

</mosaic_0001>

<bundles_post_ra>
// kernel: tpu_custom_call.1
= control target key start
LH: loop header
LB: loop body
LE: loop exit
PB: predicated region body
PF: predicated region fallthrough
CT: control target
= control target key end

     0   :  { %s1907_s0 = inlined_call_operand.vmem [shape: f32[2,4,16], index: 0, kind: input, shape index: {}]   ;;  %s1908_s1 = inlined_call_operand.hbm [shape: f32[2,4,48], index: 1, kind: input, shape index: {}]   ;;  %s1909_s2 = inlined_call_operand.hbm [shape: f32[4,4], index: 2, kind: input, shape index: {}]   ;;  %s1910_s3 = inlined_call_operand.vmem [shape: f32[16,48], index: 3, kind: input, shape index: {}]   ;;  %s1911_s4 = inlined_call_operand.hbm [shape: f32[4,48], index: 4, kind: input, shape index: {}]   ;;  %s1912_s5 = inlined_call_operand.hbm [shape: f32[4,4], index: 5, kind: input, shape index: {}]   ;;  %s1913_s6 = inlined_call_operand.vmem [shape: f32[16,6], index: 6, kind: input, shape index: {}]   ;;  %s1914_s7 = inlined_call_operand.vmem [shape: f32[4,6], index: 7, kind: input, shape index: {}]   ;;  %s1915_s8 = inlined_call_operand.hbm [shape: f32[2,4,12], index: 8, kind: output, shape index: {}]  }
   0x1   :  { %1920 = sst [smem:[#allocation15_spill]] %s1909_s2 }
   0x2   :  { %1921 = sst [smem:[#allocation16_spill]] %s1911_s4 }
   0x3   :  { %1922 = sst [smem:[#allocation17_spill]] %s1912_s5 }
   0x4   :  { %13 = vsyncpa [#allocation3], 0 }
   0x5   :  { %15 = vsyncpa [#allocation3 + $0x1], 0 }
   0x6   :  { %16 = vsyncpa [#allocation6], 0 }
   0x7   :  { %17 = vsyncpa [#allocation9], 0 }
   0x8   :  { %18 = vsyncpa [#allocation4], 0 }
   0x9   :  { %20 = vsyncpa [#allocation4 + $0x1], 0  ;;  %s1619_s27 = smov 0   ;;  %s1621_s28 = smov 0  }
   0xa   :  { %s1623_s29 = smov 0   ;;  %s1625_s30 = smov 0  }
   0xb LB: > { %s1640_s9 = sadd.s32 4294967295, %s1560_s30   ;;  %s1177_s10 = sadd.s32 4294967294, %s1560_s30   ;;  %s1560_s30 = sphi %s1625_s30, %s1945_s30   ;;  %s1556_s29 = sphi %s1623_s29, %s1944_s29   ;;  %s1552_s28 = sphi %s1621_s28, %s1943_s28   ;;  %s1548_s27 = sphi %s1619_s27, %s1942_s27  }
   0xc   : > { %p72_p0 = scmp.ne.s32.totalorder %s1552_s28, %s1548_s27  ;;  %p1916_p1 = scmp.eq.s32.totalorder %s1640_s9, 0 }
   0xd   : > { %p228_p3 = scmp.eq.s32.totalorder %s1177_s10, 1  ;;  %p1178_p5 = scmp.ge.s32.totalorder %s1560_s30, 1 }
   0xe   : > { %p1649_p4 = por %p1916_p1, %p72_p0  ;;  %p235_p7 = scmp.lt.s32.totalorder %s1560_s30, 3 }
   0xf   : > { %p1654_p6 = por %p228_p3, %p72_p0  ;;  %s1562_s14 = smov [#allocation5]  }
  0x10   : > { %s1923_s11 = scalar_select %p1649_p4, 1, 0 }
  0x11   : > { %s1924_s12 = scalar_select %p1654_p6, 1, 0 }
  0x12   : > { %p1659_p8 = pnand %p1178_p5, %p235_p7  ;;  %s248_s15 = sshll.u32 %s1562_s14, 4  ;;  %s249_s15 = int_to_ptr.vmem [resolvable:$true] %s248_s15 }
  0x13   : > { %s1563_s16 = smov [#allocation7]   ;;  %s1564_s19 = smov [#allocation8]  }
  0x14   : > { %s1925_s13 = scalar_select %p1659_p8, 1, 0 }
  0x15   : > { %p1294_p10 = pneg %p1659_p8  ;;  %s262_s17 = sshll.u32 %s1563_s16, 4  ;;  %s263_s17 = int_to_ptr.vmem [resolvable:$true] %s262_s17 }
  0x16   : > { %s273_s20 = sshll.u32 %s1564_s19, 4  ;;  %s1393_s21 = scalar_lea.vmem %s249_s15, 64  ;;  %s1672_s20 = int_to_ptr.vmem [resolvable:$true] %s273_s20 }
  0x17   : > { %p1668_p11 = pnand %p1294_p10, %p1916_p1  ;;  %p1394_p13 = scmp.ne.s32.totalorder %s249_s15, %s1393_s21 }
  0x18   : > { %p1401_p5 = scmp.lt.s32.totalorder %s249_s15, %s249_s15  ;;  %p1402_p7 = scmp.lt.s32.totalorder %s1393_s21, %s1393_s21 }
  0x19   : > { %p1384_p12 = pneg %p1668_p11 }
  0x1a   : > { %p1403_p10 = por %p1402_p7, %p1401_p5 }
  0x1b   : > { %p1396_p0 = pnand %p1394_p13, %p1384_p12 }
  0x1d   : > { %p1397_p3 = pneg %p1396_p0 }
  0x1f   : > { %p1404_p9 = pnand %p1403_p10, %p1397_p3 }
  0x21   : > { %1407 = shalt.err (!%p1404_p9)
}
  0x22   : > { %s1927_s2 = sld [smem:[#allocation15_spill]]  ;;  %s1419_s24 = scalar_lea.vmem %s263_s17, 64 }
  0x23   : > { %p1420_p1 = scmp.ne.s32.totalorder %s263_s17, %s1419_s24  ;;  %p1427_p13 = scmp.lt.s32.totalorder %s263_s17, %s263_s17 }
  0x24   : > { %p1428_p0 = scmp.lt.s32.totalorder %s1419_s24, %s1419_s24 }
  0x25   : > { %p1422_p2 = pnand %p1420_p1, %p1384_p12 }
  0x26   : > { %p1429_p4 = por %p1428_p0, %p1427_p13 }
  0x27   : > { %p1423_p6 = pneg %p1422_p2 }
  0x28   : > { %1297 = dma.hbm_to_vmem [thread:$0]  (!%p1668_p11), %s1927_s2, 64, %s249_s15, [#allocation6]  }
  0x29   : > { %p1430_p8 = pnand %p1429_p4, %p1423_p6 }
  0x2b   : > { %1433 = shalt.err (!%p1430_p8)
}
  0x2c   : > { %s1928_s4 = sld [smem:[#allocation16_spill]]  ;;  %s1445_s10 = scalar_lea.vmem %s1672_s20, 64 }
  0x2d   : > { %p1446_p9 = scmp.ne.s32.totalorder %s1672_s20, %s1445_s10  ;;  %p1453_p3 = scmp.lt.s32.totalorder %s1672_s20, %s1672_s20 }
  0x2e   : > { %p1454_p4 = scmp.lt.s32.totalorder %s1445_s10, %s1445_s10 }
  0x2f   : > { %p1448_p1 = pnand %p1446_p9, %p1384_p12 }
  0x30   : > { %p1455_p6 = por %p1454_p4, %p1453_p3 }
  0x31   : > { %p1449_p2 = pneg %p1448_p1 }
  0x32   : > { %1300 = dma.hbm_to_vmem [thread:$0]  (!%p1668_p11), %s1928_s4, 64, %s263_s17, [#allocation6]  }
  0x33   : > { %p1456_p8 = pnand %p1455_p6, %p1449_p2 }
  0x35   : > { %1459 = shalt.err (!%p1456_p8)
}
  0x36   : > { %s1929_s5 = sld [smem:[#allocation17_spill]]  ;;  %s1706_s16 = sadd.s32 1, %s1560_s30  }
  0x37   : > { %s56_s17 = ssub.s32 %s1560_s30, %s1706_s16  ;;  %s59_s18 = sadd.s32 1, %s1556_s29 }
  0x38   : > { %p57_p12 = scmp.eq.s32.totalorder %s56_s17, 0  ;;  %p66_p5 = scmp.ne.s32.totalorder %s1556_s29, %s1552_s28 }
  0x39   : > { %p67_p7 = scmp.eq.s32.totalorder %s1560_s30, 0  ;;  %p1315_p10 = scmp.lt.s32.totalorder %s1560_s30, 2 }
  0x3a   : > { %s1716_s19 = scalar_select %p57_p12, %s1556_s29, %s59_s18  }
  0x3b   : > { %p68_p13 = por %p67_p7, %p66_p5  ;;  %p1930_p0 = scmp.eq.s32.totalorder %s1640_s9, 1 }
  0x3c   : > { %1303 = dma.hbm_to_vmem [thread:$0]  (!%p1668_p11), %s1929_s5, 64, %s1672_s20, [#allocation9]  }
  0x3d   : > { %p1720_p9 = por %p1930_p0, %p66_p5  ;;  %s297_s22 = sand.u32 1, %s1556_s29  }
  0x3e   : > { %s1184_s23 = sshll.u32 %s1560_s30, 6  ;;  %s1183_s20 = sshll.u32 %s297_s22, 2 }
  0x3f   : > { %s1931_s21 = scalar_select %p1720_p9, 1, 0 }
  0x40   : > { %s1729_s26 = scalar_lea.hbm %s1908_s1, %s1184_s23  ;;  %s301_s10 = scalar_lea.vmem [#allocation2], %s1183_s20 }
  0x41   : > { %s308_s14 = sshll.u32 %s301_s10, 4  ;;  %p1731_p11 = pnand %p1315_p10, %p68_p13  ;;  %s309_s14 = int_to_ptr.vmem [resolvable:$true] %s308_s14 }
  0x42   : > { %s298_s17 = scalar_lea.sflag [#allocation3], %s297_s22  ;;  %s1460_s18 = scalar_lea.hbm %s1729_s26, 64 }
  0x43   : > { %p1461_p1 = scmp.ne.s32.totalorder %s1729_s26, %s1460_s18  ;;  %p1462_p2 = pneg %p1731_p11 }
  0x44   : > { %s1465_s25 = scalar_lea.hbm %s1908_s1, 128  ;;  %p1466_p6 = scmp.lt.s32.totalorder %s1729_s26, %s1908_s1 }
  0x45   : > { %p1463_p3 = pnand %p1462_p2, %p1461_p1  ;;  %p1467_p8 = scmp.lt.s32.totalorder %s1465_s25, %s1460_s18 }
  0x47   : > { %p1464_p4 = pneg %p1463_p3  ;;  %p1468_p12 = por %p1467_p8, %p1466_p6 }
  0x49   : > { %p1469_p5 = pnand %p1468_p12, %p1464_p4 }
  0x4b   : > { %1472 = shalt.err (!%p1469_p5)
}
  0x4c   : > { %s1473_s10 = scalar_lea.vmem %s309_s14, 64  ;;  %s1565_s22 = smov [#allocation2]  }
  0x4d   : > { %p1474_p7 = scmp.ne.s32.totalorder %s309_s14, %s1473_s10  ;;  %s1478_s4 = sshll.u32 %s1565_s22, 4  ;;  %s1479_s4 = int_to_ptr.vmem [resolvable:$false] %s1478_s4 }
  0x4e   : > { %s1480_s5 = scalar_lea.vmem %s1479_s4, 128  ;;  %p1481_p0 = scmp.lt.s32.totalorder %s309_s14, %s1479_s4 }
  0x4f   : > { %p1476_p10 = pnand %p1474_p7, %p1462_p2  ;;  %p1482_p1 = scmp.lt.s32.totalorder %s1480_s5, %s1473_s10 }
  0x51   : > { %p1477_p13 = pneg %p1476_p10  ;;  %p1483_p3 = por %p1482_p1, %p1481_p0 }
  0x53   : > { %p1484_p9 = pnand %p1483_p3, %p1477_p13 }
  0x55   : > { %1487 = shalt.err (!%p1484_p9)
}
  0x56   : > { %1307 = dma.hbm_to_vmem [thread:$0]  (!%p1731_p11), %s1729_s26, 64, %s309_s14, %s298_s17  }
  0x57   : > { %p1933_p4 = scmp.ne.s32.totalorder %s1925_s13, 0 }
  0x58   : > { %s1752_s2 = sand.u32 (!%p1933_p4), 1, %s1552_s28   ;;  %p1934_p9 = scmp.ne.s32.totalorder (!%p1933_p4), %s1923_s11, 0 }
  0x59   : > { %317 = sbr.rel (%p1933_p4) target bundleno = 2419 (0x973), region = 52  ;;  %s1186_s18 = sshll.u32 (!%p1933_p4), %s1752_s2, 2 }
  0x5a   : > { %s320_s4 = scalar_lea.sflag (!%p1933_p4), [#allocation3], %s1752_s2  ;;  %s1758_s5 = scalar_lea.vmem (!%p1933_p4), [#allocation2], %s1186_s18 }
  0x5e   : > { %1531 = dma.done.wait (%p1934_p9), %s320_s4, 64  }
  0x5f   : > { %1533 = vsyncadd (%p1934_p9), %s320_s4, 4294967232  ;;  %p1935_p11 = scmp.eq.s32.totalorder %s1640_s9, 0 }
  0x61   : > { %1535 = dma.done.wait (%p1935_p11), [#allocation6], 128   ;;  %p1936_p2 = pmov %p1935_p11 }
  0x63   : > { %1537 = vsyncadd (%p1936_p2), [#allocation6], 4294967168  ;;  %p1937_p6 = pmov %p1936_p2 }
  0x64   : > { %p1938_p8 = pmov %p1936_p2 }
  0x65   : > { %1539 = dma.done.wait (%p1937_p6), [#allocation9], 64  }
  0x66   : > { %1541 = vsyncadd (%p1938_p8), [#allocation9], 4294967232  ;;  %p372_p12 = scmp.lt.s32.totalorder %s1640_s9, 1  ;;  %v1566_v0 = vmov 0.0   ;;  %vm1567_vm0 = vmmov 0   ;;  %vm390_vm1 = vcmask 1043456  }
  0x67   : > { %1230 = vmatprep.subr.mxu0 %v1566_v0  ;;  %1232 = vmatprep.mubr.msk.f32.mxu0 %vm1567_vm0, %v1566_v0  ;;  %vm386_vm2 = vcmask 31744   ;;  %v1783_v2 = vld [vmem:[#allocation5] sm:$0xf]  ;;  %v1801_v4 = vld [vmem:[%s1910_s3] sm:$0xff]  ;;  %vm464_vm3 = vcmask 130048   ;;  %s1568_s20 = smov 96  }
  0x68   : > { %s373_s11 = scalar_select %p372_p12, %s1640_s9, 1  ;;  %1235 = vmatprep.subr.mxu1 %v1566_v0  ;;  %1239 = vmatprep.mubr.msk.f32.mxu1 %vm1567_vm0, %v1566_v0  ;;  %v1788_v3 = vld [vmem:[%s1910_s3 + $0x8] sm:$0xff]  ;;  %v1813_v11 = vld [vmem:[%s1758_s5] sm:$0xf]  ;;  %v380_v30 = vld [vmem:[#allocation8] sm:$0xf] }
  0x69   : > { %1236 = vmatpush3.msra.mxu1 %v1788_v3  ;;  %v1808_v7 = vld [vmem:[#allocation7] sm:$0xf]  ;;  %s1569_s10 = smov 32   ;;  %s1570_s22 = smov 112   ;;  %v381_v33 = vld [vmem:[%s1913_s6] sm:$0xff]  ;;  %vm1048_vm4 = vcmask 48128  }
  0x6a   : > { %s1191_s13 = sshll.u32 %s373_s11, 2  ;;  %1237 = vmatprep.subr.mxu1 %v1566_v0  ;;  %s1571_s4 = smov 16   ;;  %v382_v28 = vld [vmem:[%s1913_s6 + $0x8] sm:$0xff]  ;;  %v383_v62 = vld [vmem:[%s1914_s7] sm:$0xf]  ;;  %vm1050_vm5 = vcmask 93184  }
  0x6b   : > { %s375_s15 = scalar_lea.vmem %s1907_s0, %s1191_s13  ;;  %1238 = vmatpush3.msra.mxu1 %v1801_v4  ;;  %s1572_s17 = smov 6  }
  0x6c   : > { %v385_v1 = vld [vmem:[%s375_s15] sm:$0xf]  ;;  %1247 = vmatprep.subr.mxu1 %v1566_v0  ;;  %s1207_s23 = sshll.u32 %s1640_s9, 6  ;;  %s371_s24 = scalar_lea.vmem [#allocation10], %s1186_s18 }
  0x6d   : > { %1231 = vmatpush3.msk.msra.mxu0 %vm390_vm1, %v385_v1  ;;  %s1066_s25 = sshll.u32 %s371_s24, 4  ;;  %p1939_p7 = scmp.ne.s32.totalorder %s1931_s21, 0  ;;  %s1067_s25 = int_to_ptr.vmem [resolvable:$true] %s1066_s25 }
  0x6e   : > { %1233 = vmatmul.mubr.msk.f32.vlgmr.msra.gmra.mxu0 %vm386_vm2, %v1783_v2  ;;  %1242 = vmatprep.subr.mxu0 %v1566_v0  ;;  %s1488_s5 = scalar_lea.vmem %s1067_s25, 64  ;;  %s1573_s9 = smov [#allocation10]  }
  0x6f   : > { %1244 = vmatprep.mubr.msk.f32.mxu0 %vm1567_vm0, %v1566_v0  ;;  %p1489_p5 = scmp.ne.s32.totalorder %s1067_s25, %s1488_s5  ;;  %s1492_s18 = sshll.u32 %s1573_s9, 4  ;;  %s1493_s18 = int_to_ptr.vmem [resolvable:$false] %s1492_s18 }
  0x70   : > { %s1494_s11 = scalar_lea.vmem %s1493_s18, 128  ;;  %p1495_p0 = scmp.lt.s32.totalorder %s1067_s25, %s1493_s18 }
  0x71   : > { %p1490_p10 = pnand %p1489_p5, %p1939_p7  ;;  %p1496_p1 = scmp.lt.s32.totalorder %s1494_s11, %s1488_s5 }
  0x73   : > { %p1491_p13 = pneg %p1490_p10  ;;  %p1497_p3 = por %p1496_p1, %p1495_p0 }
  0x75   : > { %p1498_p4 = pnand %p1497_p3, %p1491_p13 }
 0x12e   : > { %v460_v5 = vpop.f32.mrf.mxu0 }
 0x12f   : > { %1240 = vmatmul.mubr.msk.f32.vlgmr.msra.gmra.mxu1 %vm464_vm3, %v460_v5 }
 0x130   : > { %v1234_v6 = vpop.f32.mrf.mxu0  ;;  %1251 = vmatprep.mubr.msk.f32.mxu1 %vm1567_vm0, %v1566_v0  ;;  %1248 = vmatpush3.msra.mxu1 %v382_v28 }
 0x131   : > { %1249 = vmatprep.subr.mxu1 %v1566_v0 }
 0x132   : > { %1250 = vmatpush3.msra.mxu1 %v381_v33 }
 0x133   : > { %1259 = vmatprep.subr.mxu1 %v1566_v0 }
 0x1ef   : > { %v534_v8 = vpop.f32.mrf.mxu1 }
 0x1f0   : > { %v535_v9 = vadd.f32 %v534_v8, %v1808_v7 }
 0x1f1   : > { %v1241_v10 = vpop.f32.mrf.mxu1 }
 0x1f2   : > { %546 = vrot.lane.b32.xlu0 %v535_v9, %s1568_s20  ;;  %v538_v12 = vadd.f32 %v535_v9, %v1813_v11 }
 0x1f4   : > { %v1195_v13 = vmul.f32 -1.442695, %v538_v12 }
 0x1f6   : > { %1362 = vpow2.f32 %v1195_v13 }
 0x203   : > { %v1363_v14 = vpop.eup %1362 }
 0x204   : > { %v542_v15 = vadd.f32 1.0, %v1363_v14 }
 0x206   : > { %1364 = vrcp.f32 %v542_v15 }
 0x213   : > { %v1365_v16 = vpop.eup %1364 }
 0x214   : > { %v556_v23 = vsub.f32 1.0, %v1365_v16 }
 0x264   : > { %v547_v17 = vpop.permute.xlu0 %546 }
 0x265   : > { %v549_v18 = vmul.f32 %v1365_v16, %v547_v17 }
 0x267   : > { %551 = vrot.lane.b32.xlu0 %v549_v18, %s1569_s10 }
 0x2d9   : > { %v552_v19 = vpop.permute.xlu0 %551 }
 0x2da   : > { %v554_v20 = vadd.f32 %v552_v19, %v1813_v11 }
 0x2dc   : > { %1366 = vtanh.f32 %v554_v20 }
 0x2e9   : > { %v1367_v21 = vpop.eup %1366 }
 0x2ea   : > { %558 = vrot.lane.b32.xlu1 %v1367_v21, %s1570_s22 }
 0x2ee   : > { %562 = vrot.lane.b32.xlu1 %v385_v1, %s1571_s4  ;;  %s1053_s4 = scalar_lea.sflag [#allocation4], %s1752_s2 }
 0x35c   : > { %v559_v22 = vpop.permute.xlu1 %558 }
 0x35d   : > { %v561_v25 = vmul.f32 %v559_v22, %v556_v23 }
 0x360   : > { %v563_v24 = vpop.permute.xlu1 %562 }
 0x361   : > { %v565_v26 = vmul.f32 %v1365_v16, %v563_v24 }
 0x363   : > { %v566_v27 = vadd.f32 %v565_v26, %v561_v25 }
 0x365   : > { %1368 = vtanh.f32 %v566_v27  ;;  %721 = vrot.lane.b32.xlu1 %v566_v27, %s1570_s22 }
 0x372   : > { %v1369_v29 = vpop.eup %1368 }
 0x373   : > { %569 = vrot.lane.b32.xlu0 %v1369_v29, %s1570_s22 }
 0x3d7   : > { %v722_v32 = vpop.permute.xlu1 %721 }
 0x3e5   : > { %v570_v31 = vpop.permute.xlu0 %569 }
 0x3e6   : > { %1243 = vmatpush3.msk.msra.mxu0 %vm390_vm1, %v570_v31 }
 0x3e7   : > { %1245 = vmatmul.mubr.msk.f32.vlgmr.msra.gmra.mxu0 %vm386_vm2, %v380_v30  ;;  %1254 = vmatprep.subr.mxu0 %v1566_v0 }
 0x3e8   : > { %1255 = vmatpush3.msk.msra.mxu0 %vm390_vm1, %v722_v32  ;;  %1256 = vmatprep.mubr.msk.f32.mxu0 %vm1567_vm0, %v1566_v0 }
 0x3e9   : > { %1266 = vmatprep.subr.mxu0 %v1566_v0 }
 0x3eb   : > { %1257 = vmatmul.mubr.msk.f32.vlgmr.msra.gmra.mxu0 %vm386_vm2, %v1783_v2 }
 0x3ec   : > { %1268 = vmatprep.mubr.msk.f32.mxu0 %vm1567_vm0, %v1566_v0 }
 0x4a7   : > { %v642_v34 = vpop.f32.mrf.mxu0 }
 0x4a8   : > { %1252 = vmatmul.mubr.msk.f32.vlgmr.msra.gmra.mxu1 %vm464_vm3, %v642_v34 }
 0x4a9   : > { %v1246_v35 = vpop.f32.mrf.mxu0  ;;  %1260 = vmatpush3.msra.mxu1 %v1788_v3  ;;  %1263 = vmatprep.mubr.msk.f32.mxu1 %vm1567_vm0, %v1566_v0 }
 0x4aa   : > { %1261 = vmatprep.subr.mxu1 %v1566_v0 }
 0x4ab   : > { %v791_v36 = vpop.f32.mrf.mxu0  ;;  %1262 = vmatpush3.msra.mxu1 %v1801_v4 }
 0x4ac   : > { %1264 = vmatmul.mubr.msk.f32.vlgmr.msra.gmra.mxu1 %vm464_vm3, %v791_v36  ;;  %1271 = vmatprep.subr.mxu1 %v1566_v0 }
 0x4ad   : > { %v1258_v37 = vpop.f32.mrf.mxu0  ;;  %1272 = vmatpush3.msra.mxu1 %v382_v28  ;;  %1275 = vmatprep.mubr.msk.f32.mxu1 %vm1567_vm0, %v1566_v0 }
 0x4ae   : > { %1273 = vmatprep.subr.mxu1 %v1566_v0 }
 0x4af   : > { %1274 = vmatpush3.msra.mxu1 %v381_v33 }
 0x568   : > { %v715_v38 = vpop.f32.mrf.mxu1 }
 0x569   : > { %v716_v3 = vadd.f32 %v715_v38, %v383_v62 }
 0x56a   : > { %v1253_v39 = vpop.f32.mrf.mxu1 }
 0x56c   : > { %v864_v40 = vpop.f32.mrf.mxu1 }
 0x56d   : > { %v865_v41 = vadd.f32 %v864_v40, %v1808_v7 }
 0x56e   : > { %v1265_v42 = vpop.f32.mrf.mxu1 }
 0x56f   : > { %876 = vrot.lane.b32.xlu0 %v865_v41, %s1568_s20  ;;  %v868_v43 = vadd.f32 %v865_v41, %v1813_v11 }
 0x571   : > { %v1202_v44 = vmul.f32 -1.442695, %v868_v43 }
 0x573   : > { %1370 = vpow2.f32 %v1202_v44 }
 0x580   : > { %v1371_v45 = vpop.eup %1370 }
 0x581   : > { %v872_v46 = vadd.f32 1.0, %v1371_v45 }
 0x583   : > { %1372 = vrcp.f32 %v872_v46 }
 0x590   : > { %v1373_v47 = vpop.eup %1372 }
 0x591   : > { %v886_v53 = vsub.f32 1.0, %v1373_v47  ;;  %v892_v55 = vmul.f32 %v1373_v47, %v566_v27 }
 0x5e1   : > { %v877_v48 = vpop.permute.xlu0 %876 }
 0x5e2   : > { %v879_v49 = vmul.f32 %v1373_v47, %v877_v48 }
 0x5e4   : > { %881 = vrot.lane.b32.xlu1 %v879_v49, %s1569_s10 }
 0x656   : > { %v882_v50 = vpop.permute.xlu1 %881 }
 0x657   : > { %v884_v51 = vadd.f32 %v882_v50, %v1813_v11 }
 0x659   : > { %1374 = vtanh.f32 %v884_v51 }
 0x666   : > { %v1375_v52 = vpop.eup %1374 }
 0x667   : > { %888 = vrot.lane.b32.xlu0 %v1375_v52, %s1570_s22 }
 0x6d9   : > { %v889_v54 = vpop.permute.xlu0 %888 }
 0x6da   : > { %v891_v56 = vmul.f32 %v889_v54, %v886_v53 }
 0x6dc   : > { %v893_v57 = vadd.f32 %v892_v55, %v891_v56 }
 0x6de   : > { %1376 = vtanh.f32 %v893_v57 }
 0x6eb   : > { %v1377_v58 = vpop.eup %1376 }
 0x6ec   : > { %896 = vrot.lane.b32.xlu1 %v1377_v58, %s1570_s22  ;;  %s1870_s22 = scalar_lea.hbm %s1915_s8, %s1207_s23 }
 0x75e   : > { %v897_v59 = vpop.permute.xlu1 %896 }
 0x75f   : > { %1267 = vmatpush3.msk.msra.mxu0 %vm390_vm1, %v897_v59 }
 0x760   : > { %1269 = vmatmul.mubr.msk.f32.vlgmr.msra.gmra.mxu0 %vm386_vm2, %v380_v30 }
 0x820   : > { %v966_v60 = vpop.f32.mrf.mxu0 }
 0x821   : > { %1276 = vmatmul.mubr.msk.f32.vlgmr.msra.gmra.mxu1 %vm464_vm3, %v966_v60 }
 0x822   : > { %v1270_v61 = vpop.f32.mrf.mxu0 }
 0x8e1   : > { %v1039_v63 = vpop.f32.mrf.mxu1 }
 0x8e2   : > { %v1040_v0 = vadd.f32 %v1039_v63, %v383_v62 }
 0x8e3   : > { %v1277_v1 = vpop.f32.mrf.mxu1 }
 0x8e4   : > { %1378 = vtanh.f32 %v1040_v0 }
 0x8e5   : > { %1380 = vtanh.f32 %v716_v3 }
 0x8f1   : > { %v1379_v2 = vpop.eup %1378 }
 0x8f2   : > { %1045 = vrot.lane.b32.xlu0 %v1379_v2, %s1572_s17  ;;  %v1381_v4 = vpop.eup %1380 }
 0x964   : > { %v1046_v5 = vpop.permute.xlu0 %1045 }
 0x965   : > { %v1049_v6 = vsel %vm1048_vm4, %v1381_v4, %v1046_v5 }
 0x966   : > { %1051 = vst.msk [vmem:[%s371_s24] sm:$0xf] %vm1050_vm5, %v1049_v6 }
 0x967   : > { %1501 = shalt.err (!%p1498_p4)
}
 0x968   : > { %s1502_s13 = scalar_lea.hbm %s1870_s22, 64  ;;  %s1506_s14 = scalar_lea.hbm %s1915_s8, 128 }
 0x969   : > { %p1503_p9 = scmp.ne.s32.totalorder %s1870_s22, %s1502_s13  ;;  %p1507_p6 = scmp.lt.s32.totalorder %s1870_s22, %s1915_s8 }
 0x96a   : > { %p1508_p8 = scmp.lt.s32.totalorder %s1506_s14, %s1502_s13 }
 0x96b   : > { %p1504_p11 = pnand %p1503_p9, %p1939_p7 }
 0x96c   : > { %p1509_p12 = por %p1508_p8, %p1507_p6 }
 0x96d   : > { %p1505_p2 = pneg %p1504_p11 }
 0x96f   : > { %p1510_p5 = pnand %p1509_p12, %p1505_p2 }
 0x971   : > { %1513 = shalt.err (!%p1510_p5)
}
 0x972   : > { %1292 = dma.vmem_to_hbm [thread:$0]  (%p1939_p7), %s1067_s25, 64, %s1870_s22, %s1053_s4  }
 0x973 PF: > { %s1078_s23 = sand.u32 1, %s1548_s27   ;;  %p1940_p10 = scmp.ne.s32.totalorder %s1924_s12, 0 }
 0x974   : > { %p1941_p13 = scmp.ge.s32.totalorder %s1560_s30, 2  ;;  %s1079_s24 = scalar_lea.sflag [#allocation4], %s1078_s23 }
 0x976   : > { %p1309_p0 = pnand %p1941_p13, %p1940_p10 }
 0x978   : > { %p1310_p1 = pneg %p1309_p0 }
 0x97a   : > { %1543 = dma.done.wait (%p1310_p1), %s1079_s24, 64  }
 0x97b   : > { %1545 = vsyncadd (%p1310_p1), %s1079_s24, 4294967232  ;;  %p23_p3 = scmp.ge.s32.totalorder %s1706_s16, 4   ;;  %s1942_s27 = smov %s1552_s28 }
 0x97c   : > { %s1943_s28 = smov %s1556_s29  ;;  %s1944_s29 = smov %s1716_s19 }
 0x97d   : > { %s1945_s30 = smov %s1706_s16  ;;  %25 = sbr.rel (!%p23_p3) target bundleno = 11 (0xb), region = 112 }
 0x982   :  { %1084 = vsyncpa [#allocation3], 1 }
 0x983   :  { %1086 = vsyncpa [#allocation3 + $0x1], 1 }
 0x984   :  { %1087 = vsyncpa [#allocation6], 1 }
 0x985   :  { %1088 = vsyncpa [#allocation9], 1 }
 0x986   :  { %1089 = vsyncpa [#allocation4], 1 }
 0x987   :  { %1091 = vsyncpa [#allocation4 + $0x1], 1 }

</bundles_post_ra>
